<compile_context>
chip_gen: v7x
topology: tpu7x:2x2x1
jax: 0.10.0
libtpu: 0.0.40
codegen_flags: <defaults>
</compile_context>

<pallas_src>
import functools

import jax
import jax.numpy as jnp
from jax.experimental import pallas as pl
from jax.experimental.pallas import tpu as pltpu

# Grayscale weights used by torchvision.transforms.functional.rgb_to_grayscale
_GRAY_R = 0.2989
_GRAY_G = 0.587
_GRAY_B = 0.114


def _colorjitter_kernel(coef_ref, img_ref, out_ref, *, pack):
    """Applies the 3 jitter ops (data-dependent order/factors) to one image block.

    coef_ref : SMEM f32 (9,)  -- per slot s: (f, a, b) at coef_ref[3*s : 3*s+3]
    img_ref  : VMEM (TB, 3*pack, L) sublane-packed RGB images (float in [0, 1])
    out_ref  : VMEM (TB, 3*pack, L)
    """
    p = pack
    r = img_ref[:, 0:p, :].astype(jnp.float32)
    g = img_ref[:, p:2 * p, :].astype(jnp.float32)
    b = img_ref[:, 2 * p:3 * p, :].astype(jnp.float32)
    L = r.shape[2]
    inv_n = 1.0 / float(p * L)

    # Statically unrolled over the 3 slots; the actual op per slot is encoded in
    # the (f, a, b) coefficients coming from SMEM.
    for slot in range(3):
        f = coef_ref[3 * slot + 0]
        ca = coef_ref[3 * slot + 1]
        cb = coef_ref[3 * slot + 2]

        gray = _GRAY_R * r + _GRAY_G * g + _GRAY_B * b             # (TB, p, L)
        mean = jnp.sum(jnp.sum(gray, axis=2, keepdims=True),
                       axis=1, keepdims=True) * inv_n               # (TB, 1, 1)
        add = ca * mean + cb * gray                                  # (TB, p, L)

        r = jnp.clip(f * r + add, 0.0, 1.0)
        g = jnp.clip(f * g + add, 0.0, 1.0)
        b = jnp.clip(f * b + add, 0.0, 1.0)

    out_ref[:, 0:p, :] = r.astype(out_ref.dtype)
    out_ref[:, p:2 * p, :] = g.astype(out_ref.dtype)
    out_ref[:, 2 * p:3 * p, :] = b.astype(out_ref.dtype)


def _sample_params(key, brightness, contrast, saturation):
    """Samples (application order of the 3 ops, their factors), all on-device."""
    k_order, k_b, k_c, k_s = jax.random.split(key, 4)
    # torchvision samples a permutation of 4 ops (incl. hue); hue==0 -> dropped,
    # so only the relative order of the 3 real ops (0:bright,1:contrast,2:sat)
    # is needed.
    order4 = jax.random.permutation(k_order, 4)
    slots = jnp.argsort(order4)[:3]                   # position of op 0/1/2 in perm
    order3 = jnp.argsort(slots).astype(jnp.int32)     # ops in application order
    factors = jnp.stack([
        jax.random.uniform(k_b, (), minval=1.0 - brightness, maxval=1.0 + brightness),
        jax.random.uniform(k_c, (), minval=1.0 - contrast, maxval=1.0 + contrast),
        jax.random.uniform(k_s, (), minval=1.0 - saturation, maxval=1.0 + saturation),
    ]).astype(jnp.float32)
    return order3, factors


def _params_to_coefs(order3, factors):
    """(order, factors) -> flat (9,) per-slot coefficients (f, a, b)."""
    f_slot = factors[order3]                       # factor of the op in each slot
    one_minus = 1.0 - f_slot
    a_slot = jnp.where(order3 == 1, one_minus, 0.0)   # contrast -> blend with mean
    b_slot = jnp.where(order3 == 2, one_minus, 0.0)   # saturation -> blend with gray
    return jnp.stack([f_slot, a_slot, b_slot], axis=1).reshape(-1).astype(jnp.float32)


def _choose_pack(hw):
    """Largest sublane pack in {8,4,2,1}, preferring a lane-dense layout (L%128==0)."""
    candidates = [p for p in (8, 4, 2, 1) if hw % p == 0]
    return max(candidates, key=lambda p: ((hw // p) % 128 == 0, p))


def color_jitter(batch, key, brightness=0.25, contrast=0.25, saturation=0.25):
    """Mirrors ColorJitter.forward: jitters batch['image'] (functionally).

    Fully traceable / jit-safe: op order and factors are device arrays fed to
    the kernel through scalar prefetch (SMEM); one compile serves every key.
    """
    img = batch["image"]                     # (B, 3, H, W), float in [0, 1]
    B, C, H, W = img.shape
    assert C == 3, "ColorJitter expects RGB images"
    HW = H * W

    order3, factors = _sample_params(key, brightness, contrast, saturation)
    coefs = _params_to_coefs(order3, factors)

    # ---- layout: pack channels into sublanes, keep lanes dense when possible ----
    pack = _choose_pack(HW)
    S = 3 * pack
    L = HW // pack
    img_packed = img.reshape(B, S, L)

    # ---- block sizing: several images per grid step for small images ----
    per_img_bytes = 3 * HW * jnp.dtype(img.dtype).itemsize
    target_block_bytes = 2 * 1024 * 1024
    tb = max(1, min(B, target_block_bytes // max(per_img_bytes, 1)))
    while B % tb != 0:
        tb -= 1
    block_bytes = tb * per_img_bytes
    vmem_limit = int(min(64 * 1024 * 1024, max(32 * 1024 * 1024, 6 * block_bytes)))
    # TODO(synk): for very large images (single-image block >> 8 MiB) tile the
    # spatial axis and compute the contrast mean with a two-pass scheme.

    kernel = functools.partial(_colorjitter_kernel, pack=pack)

    out_packed = pl.pallas_call(
        kernel,
        out_shape=jax.ShapeDtypeStruct((B, S, L), img.dtype),
        grid_spec=pltpu.PrefetchScalarGridSpec(
            num_scalar_prefetch=1,
            grid=(B // tb,),
            in_specs=[pl.BlockSpec((tb, S, L), lambda i, c: (i, 0, 0))],
            out_specs=pl.BlockSpec((tb, S, L), lambda i, c: (i, 0, 0)),
        ),
        compiler_params=pltpu.CompilerParams(
            dimension_semantics=("parallel",),
            vmem_limit_bytes=vmem_limit),
    )(coefs, img_packed)

    new_batch = dict(batch)
    new_batch["image"] = out_packed.reshape(B, C, H, W)
    return new_batch


def _reference_jitter(img, order3, factors):
    """Pure-JAX reference matching torchvision semantics (hue=0)."""
    x = img.astype(jnp.float32)

    def gray(v):
        return _GRAY_R * v[:, 0:1] + _GRAY_G * v[:, 1:2] + _GRAY_B * v[:, 2:3]

    for op in [int(o) for o in order3]:
        f = float(factors[op])
        if op == 0:                                   # brightness
            x = jnp.clip(f * x, 0.0, 1.0)
        elif op == 1:                                 # contrast
            m = jnp.mean(gray(x), axis=(1, 2, 3), keepdims=True)
            x = jnp.clip(f * x + (1.0 - f) * m, 0.0, 1.0)
        else:                                         # saturation
            x = jnp.clip(f * x + (1.0 - f) * gray(x), 0.0, 1.0)
    return x


if __name__ == "__main__":
    key = jax.random.PRNGKey(0)
    k_img, k_jit = jax.random.split(key)

    B, C, H, W = 2, 3, 16, 16
    image = jax.random.uniform(k_img, (B, C, H, W), dtype=jnp.float32)  # in [0, 1]
    batch = {"image": image, "labels": jnp.arange(B, dtype=jnp.int32)}

    out_batch = color_jitter(batch, k_jit)
    out = jax.block_until_ready(out_batch["image"])

    assert out.shape == (B, C, H, W)
    assert out.dtype == jnp.float32
    assert bool(jnp.all(out >= 0.0)) and bool(jnp.all(out <= 1.0))

    # correctness vs. pure-JAX reference using the same (deterministic) params
    order3, factors = _sample_params(k_jit, 0.25, 0.25, 0.25)
    ref = _reference_jitter(image, jax.device_get(order3), jax.device_get(factors))
    assert bool(jnp.allclose(out, ref, atol=1e-5, rtol=1e-5)), "mismatch vs reference"

    print("KERNEL_OK")
</pallas_src>

<mosaic_0001>
module attributes {stable_mosaic.version = 11 : i64} {
  func.func @_colorjitter_kernel(%arg0: i32, %arg1: memref<9xf32, #tpu.memory_space<smem>>, %arg2: memref<2x6x128xf32, #tpu.memory_space<vmem>>, %arg3: memref<2x6x128xf32, #tpu.memory_space<vmem>>) attributes {dimension_semantics = [#tpu.dimension_semantics<parallel>], iteration_bounds = array<i64: 1>, scalar_prefetch = 1 : i64, scratch_operands = 0 : i64, tpu.core_type = #tpu.core_type<tc>, window_params = [{transform_indices = @transform_0, window_bounds = array<i64: 2, 6, 128>}, {transform_indices = @transform_1, window_bounds = array<i64: 2, 6, 128>}]} {
    %c0 = arith.constant 0 : index
    %c0_0 = arith.constant 0 : index
    %c0_1 = arith.constant 0 : index
    %0 = vector.load %arg2[%c0, %c0_0, %c0_1] : memref<2x6x128xf32, #tpu.memory_space<vmem>>, vector<2x2x128xf32>
    %c0_2 = arith.constant 0 : index
    %c2 = arith.constant 2 : index
    %c0_3 = arith.constant 0 : index
    %1 = vector.load %arg2[%c0_2, %c2, %c0_3] : memref<2x6x128xf32, #tpu.memory_space<vmem>>, vector<2x2x128xf32>
    %c0_4 = arith.constant 0 : index
    %c4 = arith.constant 4 : index
    %c0_5 = arith.constant 0 : index
    %2 = vector.load %arg2[%c0_4, %c4, %c0_5] : memref<2x6x128xf32, #tpu.memory_space<vmem>>, vector<2x2x128xf32>
    %c0_6 = arith.constant 0 : index
    %3 = memref.load %arg1[%c0_6] : memref<9xf32, #tpu.memory_space<smem>>
    %c1 = arith.constant 1 : index
    %4 = memref.load %arg1[%c1] : memref<9xf32, #tpu.memory_space<smem>>
    %c2_7 = arith.constant 2 : index
    %5 = memref.load %arg1[%c2_7] : memref<9xf32, #tpu.memory_space<smem>>
    %cst = arith.constant 2.989000e-01 : f32
    %6 = vector.broadcast %cst : f32 to vector<2x2x128xf32>
    %7 = arith.mulf %6, %0 : vector<2x2x128xf32>
    %cst_8 = arith.constant 5.870000e-01 : f32
    %8 = vector.broadcast %cst_8 : f32 to vector<2x2x128xf32>
    %9 = arith.mulf %8, %1 : vector<2x2x128xf32>
    %10 = arith.addf %7, %9 : vector<2x2x128xf32>
    %cst_9 = arith.constant 1.140000e-01 : f32
    %11 = vector.broadcast %cst_9 : f32 to vector<2x2x128xf32>
    %12 = arith.mulf %11, %2 : vector<2x2x128xf32>
    %13 = arith.addf %10, %12 : vector<2x2x128xf32>
    %cst_10 = arith.constant dense<0.000000e+00> : vector<2x2xf32>
    %14 = vector.multi_reduction <add>, %13, %cst_10 [2] : vector<2x2x128xf32> to vector<2x2xf32>
    %15 = vector.shape_cast %14 : vector<2x2xf32> to vector<2x2x1xf32>
    %cst_11 = arith.constant dense<0.000000e+00> : vector<2x1xf32>
    %16 = vector.multi_reduction <add>, %15, %cst_11 [1] : vector<2x2x1xf32> to vector<2x1xf32>
    %17 = vector.shape_cast %16 : vector<2x1xf32> to vector<2x1x1xf32>
    %cst_12 = arith.constant 3.906250e-03 : f32
    %18 = vector.broadcast %cst_12 : f32 to vector<2x1x1xf32>
    %19 = arith.mulf %17, %18 : vector<2x1x1xf32>
    %20 = vector.broadcast %4 : f32 to vector<2x1x1xf32>
    %21 = arith.mulf %20, %19 : vector<2x1x1xf32>
    %22 = vector.broadcast %5 : f32 to vector<2x2x128xf32>
    %23 = arith.mulf %22, %13 : vector<2x2x128xf32>
    %24 = vector.broadcast %21 : vector<2x1x1xf32> to vector<2x2x128xf32>
    %25 = arith.addf %24, %23 : vector<2x2x128xf32>
    %26 = vector.broadcast %3 : f32 to vector<2x2x128xf32>
    %27 = arith.mulf %26, %0 : vector<2x2x128xf32>
    %28 = arith.addf %27, %25 : vector<2x2x128xf32>
    %cst_13 = arith.constant 0.000000e+00 : f32
    %cst_14 = arith.constant 1.000000e+00 : f32
    %29 = vector.broadcast %cst_13 : f32 to vector<2x2x128xf32>
    %30 = arith.maximumf %29, %28 : vector<2x2x128xf32>
    %31 = vector.broadcast %cst_14 : f32 to vector<2x2x128xf32>
    %32 = arith.minimumf %31, %30 : vector<2x2x128xf32>
    %33 = vector.broadcast %3 : f32 to vector<2x2x128xf32>
    %34 = arith.mulf %33, %1 : vector<2x2x128xf32>
    %35 = arith.addf %34, %25 : vector<2x2x128xf32>
    %cst_15 = arith.constant 0.000000e+00 : f32
    %cst_16 = arith.constant 1.000000e+00 : f32
    %36 = vector.broadcast %cst_15 : f32 to vector<2x2x128xf32>
    %37 = arith.maximumf %36, %35 : vector<2x2x128xf32>
    %38 = vector.broadcast %cst_16 : f32 to vector<2x2x128xf32>
    %39 = arith.minimumf %38, %37 : vector<2x2x128xf32>
    %40 = vector.broadcast %3 : f32 to vector<2x2x128xf32>
    %41 = arith.mulf %40, %2 : vector<2x2x128xf32>
    %42 = arith.addf %41, %25 : vector<2x2x128xf32>
    %cst_17 = arith.constant 0.000000e+00 : f32
    %cst_18 = arith.constant 1.000000e+00 : f32
    %43 = vector.broadcast %cst_17 : f32 to vector<2x2x128xf32>
    %44 = arith.maximumf %43, %42 : vector<2x2x128xf32>
    %45 = vector.broadcast %cst_18 : f32 to vector<2x2x128xf32>
    %46 = arith.minimumf %45, %44 : vector<2x2x128xf32>
    %c3 = arith.constant 3 : index
    %47 = memref.load %arg1[%c3] : memref<9xf32, #tpu.memory_space<smem>>
    %c4_19 = arith.constant 4 : index
    %48 = memref.load %arg1[%c4_19] : memref<9xf32, #tpu.memory_space<smem>>
    %c5 = arith.constant 5 : index
    %49 = memref.load %arg1[%c5] : memref<9xf32, #tpu.memory_space<smem>>
    %cst_20 = arith.constant 2.989000e-01 : f32
    %50 = vector.broadcast %cst_20 : f32 to vector<2x2x128xf32>
    %51 = arith.mulf %50, %32 : vector<2x2x128xf32>
    %cst_21 = arith.constant 5.870000e-01 : f32
    %52 = vector.broadcast %cst_21 : f32 to vector<2x2x128xf32>
    %53 = arith.mulf %52, %39 : vector<2x2x128xf32>
    %54 = arith.addf %51, %53 : vector<2x2x128xf32>
    %cst_22 = arith.constant 1.140000e-01 : f32
    %55 = vector.broadcast %cst_22 : f32 to vector<2x2x128xf32>
    %56 = arith.mulf %55, %46 : vector<2x2x128xf32>
    %57 = arith.addf %54, %56 : vector<2x2x128xf32>
    %cst_23 = arith.constant dense<0.000000e+00> : vector<2x2xf32>
    %58 = vector.multi_reduction <add>, %57, %cst_23 [2] : vector<2x2x128xf32> to vector<2x2xf32>
    %59 = vector.shape_cast %58 : vector<2x2xf32> to vector<2x2x1xf32>
    %cst_24 = arith.constant dense<0.000000e+00> : vector<2x1xf32>
    %60 = vector.multi_reduction <add>, %59, %cst_24 [1] : vector<2x2x1xf32> to vector<2x1xf32>
    %61 = vector.shape_cast %60 : vector<2x1xf32> to vector<2x1x1xf32>
    %cst_25 = arith.constant 3.906250e-03 : f32
    %62 = vector.broadcast %cst_25 : f32 to vector<2x1x1xf32>
    %63 = arith.mulf %61, %62 : vector<2x1x1xf32>
    %64 = vector.broadcast %48 : f32 to vector<2x1x1xf32>
    %65 = arith.mulf %64, %63 : vector<2x1x1xf32>
    %66 = vector.broadcast %49 : f32 to vector<2x2x128xf32>
    %67 = arith.mulf %66, %57 : vector<2x2x128xf32>
    %68 = vector.broadcast %65 : vector<2x1x1xf32> to vector<2x2x128xf32>
    %69 = arith.addf %68, %67 : vector<2x2x128xf32>
    %70 = vector.broadcast %47 : f32 to vector<2x2x128xf32>
    %71 = arith.mulf %70, %32 : vector<2x2x128xf32>
    %72 = arith.addf %71, %69 : vector<2x2x128xf32>
    %cst_26 = arith.constant 0.000000e+00 : f32
    %cst_27 = arith.constant 1.000000e+00 : f32
    %73 = vector.broadcast %cst_26 : f32 to vector<2x2x128xf32>
    %74 = arith.maximumf %73, %72 : vector<2x2x128xf32>
    %75 = vector.broadcast %cst_27 : f32 to vector<2x2x128xf32>
    %76 = arith.minimumf %75, %74 : vector<2x2x128xf32>
    %77 = vector.broadcast %47 : f32 to vector<2x2x128xf32>
    %78 = arith.mulf %77, %39 : vector<2x2x128xf32>
    %79 = arith.addf %78, %69 : vector<2x2x128xf32>
    %cst_28 = arith.constant 0.000000e+00 : f32
    %cst_29 = arith.constant 1.000000e+00 : f32
    %80 = vector.broadcast %cst_28 : f32 to vector<2x2x128xf32>
    %81 = arith.maximumf %80, %79 : vector<2x2x128xf32>
    %82 = vector.broadcast %cst_29 : f32 to vector<2x2x128xf32>
    %83 = arith.minimumf %82, %81 : vector<2x2x128xf32>
    %84 = vector.broadcast %47 : f32 to vector<2x2x128xf32>
    %85 = arith.mulf %84, %46 : vector<2x2x128xf32>
    %86 = arith.addf %85, %69 : vector<2x2x128xf32>
    %cst_30 = arith.constant 0.000000e+00 : f32
    %cst_31 = arith.constant 1.000000e+00 : f32
    %87 = vector.broadcast %cst_30 : f32 to vector<2x2x128xf32>
    %88 = arith.maximumf %87, %86 : vector<2x2x128xf32>
    %89 = vector.broadcast %cst_31 : f32 to vector<2x2x128xf32>
    %90 = arith.minimumf %89, %88 : vector<2x2x128xf32>
    %c6 = arith.constant 6 : index
    %91 = memref.load %arg1[%c6] : memref<9xf32, #tpu.memory_space<smem>>
    %c7 = arith.constant 7 : index
    %92 = memref.load %arg1[%c7] : memref<9xf32, #tpu.memory_space<smem>>
    %c8 = arith.constant 8 : index
    %93 = memref.load %arg1[%c8] : memref<9xf32, #tpu.memory_space<smem>>
    %cst_32 = arith.constant 2.989000e-01 : f32
    %94 = vector.broadcast %cst_32 : f32 to vector<2x2x128xf32>
    %95 = arith.mulf %94, %76 : vector<2x2x128xf32>
    %cst_33 = arith.constant 5.870000e-01 : f32
    %96 = vector.broadcast %cst_33 : f32 to vector<2x2x128xf32>
    %97 = arith.mulf %96, %83 : vector<2x2x128xf32>
    %98 = arith.addf %95, %97 : vector<2x2x128xf32>
    %cst_34 = arith.constant 1.140000e-01 : f32
    %99 = vector.broadcast %cst_34 : f32 to vector<2x2x128xf32>
    %100 = arith.mulf %99, %90 : vector<2x2x128xf32>
    %101 = arith.addf %98, %100 : vector<2x2x128xf32>
    %cst_35 = arith.constant dense<0.000000e+00> : vector<2x2xf32>
    %102 = vector.multi_reduction <add>, %101, %cst_35 [2] : vector<2x2x128xf32> to vector<2x2xf32>
    %103 = vector.shape_cast %102 : vector<2x2xf32> to vector<2x2x1xf32>
    %cst_36 = arith.constant dense<0.000000e+00> : vector<2x1xf32>
    %104 = vector.multi_reduction <add>, %103, %cst_36 [1] : vector<2x2x1xf32> to vector<2x1xf32>
    %105 = vector.shape_cast %104 : vector<2x1xf32> to vector<2x1x1xf32>
    %cst_37 = arith.constant 3.906250e-03 : f32
    %106 = vector.broadcast %cst_37 : f32 to vector<2x1x1xf32>
    %107 = arith.mulf %105, %106 : vector<2x1x1xf32>
    %108 = vector.broadcast %92 : f32 to vector<2x1x1xf32>
    %109 = arith.mulf %108, %107 : vector<2x1x1xf32>
    %110 = vector.broadcast %93 : f32 to vector<2x2x128xf32>
    %111 = arith.mulf %110, %101 : vector<2x2x128xf32>
    %112 = vector.broadcast %109 : vector<2x1x1xf32> to vector<2x2x128xf32>
    %113 = arith.addf %112, %111 : vector<2x2x128xf32>
    %114 = vector.broadcast %91 : f32 to vector<2x2x128xf32>
    %115 = arith.mulf %114, %76 : vector<2x2x128xf32>
    %116 = arith.addf %115, %113 : vector<2x2x128xf32>
    %cst_38 = arith.constant 0.000000e+00 : f32
    %cst_39 = arith.constant 1.000000e+00 : f32
    %117 = vector.broadcast %cst_38 : f32 to vector<2x2x128xf32>
    %118 = arith.maximumf %117, %116 : vector<2x2x128xf32>
    %119 = vector.broadcast %cst_39 : f32 to vector<2x2x128xf32>
    %120 = arith.minimumf %119, %118 : vector<2x2x128xf32>
    %121 = vector.broadcast %91 : f32 to vector<2x2x128xf32>
    %122 = arith.mulf %121, %83 : vector<2x2x128xf32>
    %123 = arith.addf %122, %113 : vector<2x2x128xf32>
    %cst_40 = arith.constant 0.000000e+00 : f32
    %cst_41 = arith.constant 1.000000e+00 : f32
    %124 = vector.broadcast %cst_40 : f32 to vector<2x2x128xf32>
    %125 = arith.maximumf %124, %123 : vector<2x2x128xf32>
    %126 = vector.broadcast %cst_41 : f32 to vector<2x2x128xf32>
    %127 = arith.minimumf %126, %125 : vector<2x2x128xf32>
    %128 = vector.broadcast %91 : f32 to vector<2x2x128xf32>
    %129 = arith.mulf %128, %90 : vector<2x2x128xf32>
    %130 = arith.addf %129, %113 : vector<2x2x128xf32>
    %cst_42 = arith.constant 0.000000e+00 : f32
    %cst_43 = arith.constant 1.000000e+00 : f32
    %131 = vector.broadcast %cst_42 : f32 to vector<2x2x128xf32>
    %132 = arith.maximumf %131, %130 : vector<2x2x128xf32>
    %133 = vector.broadcast %cst_43 : f32 to vector<2x2x128xf32>
    %134 = arith.minimumf %133, %132 : vector<2x2x128xf32>
    %c0_44 = arith.constant 0 : index
    %c0_45 = arith.constant 0 : index
    %c0_46 = arith.constant 0 : index
    %135 = vector.load %arg3[%c0_44, %c0_45, %c0_46] : memref<2x6x128xf32, #tpu.memory_space<vmem>>, vector<2x2x128xf32>
    tpu.vector_store %arg3[%c0_44, %c0_45, %c0_46], %120 {strides = array<i32>} : memref<2x6x128xf32, #tpu.memory_space<vmem>>, vector<2x2x128xf32>,
    %c0_47 = arith.constant 0 : index
    %c2_48 = arith.constant 2 : index
    %c0_49 = arith.constant 0 : index
    %136 = vector.load %arg3[%c0_47, %c2_48, %c0_49] : memref<2x6x128xf32, #tpu.memory_space<vmem>>, vector<2x2x128xf32>
    tpu.vector_store %arg3[%c0_47, %c2_48, %c0_49], %127 {strides = array<i32>} : memref<2x6x128xf32, #tpu.memory_space<vmem>>, vector<2x2x128xf32>,
    %c0_50 = arith.constant 0 : index
    %c4_51 = arith.constant 4 : index
    %c0_52 = arith.constant 0 : index
    %137 = vector.load %arg3[%c0_50, %c4_51, %c0_52] : memref<2x6x128xf32, #tpu.memory_space<vmem>>, vector<2x2x128xf32>
    tpu.vector_store %arg3[%c0_50, %c4_51, %c0_52], %134 {strides = array<i32>} : memref<2x6x128xf32, #tpu.memory_space<vmem>>, vector<2x2x128xf32>,
    return
  }
  func.func @transform_0(%arg0: i32, %arg1: memref<9xf32, #tpu.memory_space<smem>>) -> (i32, i32, i32) {
    %c0_i32 = arith.constant 0 : i32
    %c0_i32_0 = arith.constant 0 : i32
    %c0_i32_1 = arith.constant 0 : i32
    return %arg0, %c0_i32, %c0_i32_0 : i32, i32, i32
  }
  func.func @transform_1(%arg0: i32, %arg1: memref<9xf32, #tpu.memory_space<smem>>) -> (i32, i32, i32) {
    %c0_i32 = arith.constant 0 : i32
    %c0_i32_0 = arith.constant 0 : i32
    %c0_i32_1 = arith.constant 0 : i32
    return %arg0, %c0_i32, %c0_i32_0 : i32, i32, i32
  }
}

</mosaic_0001>

<bundles_post_ra>
// kernel: tpu_custom_call.1
= control target key start
LH: loop header
LB: loop body
LE: loop exit
PB: predicated region body
PF: predicated region fallthrough
CT: control target
= control target key end

     0   :  { %s326_s0 = inlined_call_operand.vmem [shape: f32[9], index: 0, kind: input, shape index: {}]   ;;  %s327_s1 = inlined_call_operand.vmem [shape: f32[2,6,128], index: 1, kind: input, shape index: {}]   ;;  %s328_s2 = inlined_call_operand.vmem [shape: f32[2,6,128], index: 2, kind: output, shape index: {}]  }
   0x1   :  { %s7_s11 = sshll.u32 %s326_s0, 4  ;;  %s8_s11 = int_to_ptr.vmem [resolvable:$true] %s7_s11 }
   0x2   :  { %s245_s12 = scalar_lea.vmem %s8_s11, 16  ;;  %p250_p1 = scmp.lt.s32.totalorder %s8_s11, %s8_s11 }
   0x3   :  { %p246_p0 = scmp.ne.s32.totalorder %s8_s11, %s245_s12  ;;  %p251_p2 = scmp.lt.s32.totalorder %s245_s12, %s245_s12 }
   0x5   :  { %p252_p3 = por %p251_p2, %p250_p1 }
   0x7   :  { %p253_p4 = pnand %p252_p3, %p246_p0 }
   0x9   :  { %256 = shalt.err (!%p253_p4)  }
   0xa   :  { %s259_s13 = smov [#allocation3]  }
   0xb   :  { %10 = dma.vmem_to_smem %s8_s11, 16, %s259_s13, [#allocation2] }
   0xc   :  { %257 = dma.done.wait [#allocation2], 16 }
   0xd   :  { %258 = vsyncadd [#allocation2], 4294967280 }
   0xe   :  { %12 = sfence }
   0xf   :  { %v15_v0 = vld [vmem:[%s327_s1] sm:$0x3]  ;;  %v17_v1 = vld [vmem:[%s327_s1 + $0x2] sm:$0x3]  ;;  %v19_v2 = vld [vmem:[%s327_s1 + $0x4] sm:$0x3] }
  0x10   :  { %v24_v3 = vmul.f32 0.2989, %v15_v0  ;;  %v26_v4 = vmul.f32 0.587, %v17_v1  ;;  %v30_v5 = vmul.f32 0.114, %v19_v2 }
  0x11   :  { %v16_v6 = vld [vmem:[%s327_s1 + $0x8] sm:$0x3]  ;;  %v18_v7 = vld [vmem:[%s327_s1 + $0xa] sm:$0x3]  ;;  %v20_v8 = vld [vmem:[%s327_s1 + $0xc] sm:$0x3] }
  0x12   :  { %v28_v9 = vadd.f32 %v26_v4, %v24_v3  ;;  %v25_v10 = vmul.f32 0.2989, %v16_v6  ;;  %v27_v11 = vmul.f32 0.587, %v18_v7  ;;  %vm34_vm0 = vcmask 1041408   ;;  %s237_s25 = sld [smem:[#allocation3 + $0x2]] }
  0x13   :  { %v31_v12 = vmul.f32 0.114, %v20_v8  ;;  %s21_s1 = sld [smem:[#allocation3]]  ;;  %s236_s26 = sld [smem:[#allocation3 + $0x1]] }
  0x14   :  { %v32_v13 = vadd.f32 %v30_v5, %v28_v9  ;;  %v29_v14 = vadd.f32 %v27_v11, %v25_v10  ;;  %s240_s27 = sld [smem:[#allocation3 + $0x5]]  ;;  %s239_s28 = sld [smem:[#allocation3 + $0x4]] }
  0x15   :  { %s238_s29 = sld [smem:[#allocation3 + $0x3]]  ;;  %s243_s30 = sld [smem:[#allocation3 + $0x8]] }
  0x16   :  { %v35_v15 = vsel %vm34_vm0, %v32_v13, 0.0  ;;  %v33_v16 = vadd.f32 %v31_v12, %v29_v14  ;;  %s242_s3 = sld [smem:[#allocation3 + $0x7]]  ;;  %s241_s4 = sld [smem:[#allocation3 + $0x6]] }
  0x17   :  { %36 = vadd.xlane.f32.xlu0 %v35_v15 }
  0x18   :  { %v38_v17 = vsel %vm34_vm0, %v33_v16, 0.0  ;;  %v60_v30 = vstv %s237_s25 }
  0x19   :  { %v65_v31 = vstv %s21_s1  ;;  %v57_v34 = vstv %s236_s26  ;;  %v61_v35 = vmul.f32 %v60_v30, %v32_v13  ;;  %v62_v43 = vmul.f32 %v60_v30, %v33_v16 }
  0x1a   :  { %v66_v38 = vmul.f32 %v65_v31, %v15_v0  ;;  %v74_v39 = vmul.f32 %v65_v31, %v17_v1  ;;  %v82_v40 = vmul.f32 %v65_v31, %v19_v2  ;;  %v67_v46 = vmul.f32 %v65_v31, %v16_v6 }
  0x1b   :  { %39 = vadd.xlane.f32.xlu0 %v38_v17  ;;  %v75_v51 = vmul.f32 %v65_v31, %v18_v7  ;;  %v83_v52 = vmul.f32 %v65_v31, %v20_v8  ;;  %v128_v30 = vstv %s240_s27  ;;  %v125_v31 = vstv %s239_s28 }
  0xa4   :  { %v37_v18 = vpop.xlane.xlu0 %36 }
  0xa5   :  { %v41_v19 = vsel %vm34_vm0, %v37_v18, 0.0 }
  0xa6   :  { %v42_v20 = vrot.slane %v41_v19, 4 }
  0xa8   :  { %v43_v21 = vadd.f32 %v42_v20, %v41_v19  ;;  %v40_v22 = vpop.xlane.xlu0 %39 }
  0xa9   :  { %v48_v23 = vsel %vm34_vm0, %v40_v22, 0.0 }
  0xaa   :  { %v44_v24 = vrot.slane %v43_v21, 2  ;;  %v49_v25 = vrot.slane %v48_v23, 4 }
  0xac   :  { %v45_v26 = vadd.f32 %v44_v24, %v43_v21  ;;  %v50_v27 = vadd.f32 %v49_v25, %v48_v23 }
  0xae   :  { %v46_v28 = vrot.slane %v45_v26, 1  ;;  %v51_v29 = vrot.slane %v50_v27, 2 }
  0xb0   :  { %v47_v32 = vadd.f32 %v46_v28, %v45_v26  ;;  %v52_v33 = vadd.f32 %v51_v29, %v50_v27 }
  0xb2   :  { %v55_v36 = vmul.f32 0.00390625, %v47_v32  ;;  %v53_v37 = vrot.slane %v52_v33, 1 }
  0xb4   :  { %v58_v41 = vmul.f32 %v57_v34, %v55_v36  ;;  %v54_v42 = vadd.f32 %v53_v37, %v52_v33 }
  0xb6   :  { %v63_v44 = vadd.f32 %v61_v35, %v58_v41  ;;  %v56_v45 = vmul.f32 0.00390625, %v54_v42 }
  0xb8   :  { %v59_v47 = vmul.f32 %v57_v34, %v56_v45  ;;  %v68_v48 = vadd.f32 %v66_v38, %v63_v44  ;;  %v76_v49 = vadd.f32 %v74_v39, %v63_v44  ;;  %v84_v50 = vadd.f32 %v82_v40, %v63_v44 }
  0xb9   :  { %v133_v34 = vstv %s238_s29 }
  0xba   :  { %v64_v53 = vadd.f32 %v62_v43, %v59_v47  ;;  %v70_v54 = vmax.f32 %v68_v48, 0.0  ;;  %v78_v55 = vmax.f32 %v76_v49, 0.0  ;;  %v86_v56 = vmax.f32 %v84_v50, 0.0 }
  0xbc   :  { %v72_v57 = vmin.f32 %v70_v54, 1.0  ;;  %v80_v58 = vmin.f32 %v78_v55, 1.0  ;;  %v88_v59 = vmin.f32 %v86_v56, 1.0  ;;  %v69_v60 = vadd.f32 %v67_v46, %v64_v53 }
  0xbd   :  { %v77_v61 = vadd.f32 %v75_v51, %v64_v53  ;;  %v85_v62 = vadd.f32 %v83_v52, %v64_v53 }
  0xbe   :  { %v93_v63 = vmul.f32 0.2989, %v72_v57  ;;  %v95_v0 = vmul.f32 0.587, %v80_v58  ;;  %v71_v1 = vmax.f32 %v69_v60, 0.0  ;;  %v134_v39 = vmul.f32 %v133_v34, %v72_v57 }
  0xbf   :  { %v79_v2 = vmax.f32 %v77_v61, 0.0  ;;  %v99_v4 = vmul.f32 0.114, %v88_v59  ;;  %v87_v5 = vmax.f32 %v85_v62, 0.0  ;;  %v142_v40 = vmul.f32 %v133_v34, %v80_v58 }
  0xc0   :  { %v97_v3 = vadd.f32 %v95_v0, %v93_v63  ;;  %v73_v6 = vmin.f32 %v71_v1, 1.0  ;;  %v150_v41 = vmul.f32 %v133_v34, %v88_v59 }
  0xc1   :  { %v81_v7 = vmin.f32 %v79_v2, 1.0  ;;  %v89_v9 = vmin.f32 %v87_v5, 1.0 }
  0xc2   :  { %v101_v8 = vadd.f32 %v99_v4, %v97_v3  ;;  %v94_v10 = vmul.f32 0.2989, %v73_v6  ;;  %v135_v52 = vmul.f32 %v133_v34, %v73_v6 }
  0xc3   :  { %v96_v11 = vmul.f32 0.587, %v81_v7  ;;  %v100_v14 = vmul.f32 0.114, %v89_v9  ;;  %v143_v53 = vmul.f32 %v133_v34, %v81_v7  ;;  %v151_v54 = vmul.f32 %v133_v34, %v89_v9 }
  0xc4   :  { %v103_v12 = vsel %vm34_vm0, %v101_v8, 0.0  ;;  %v129_v36 = vmul.f32 %v128_v30, %v101_v8 }
  0xc5   :  { %104 = vadd.xlane.f32.xlu1 %v103_v12  ;;  %v98_v13 = vadd.f32 %v96_v11, %v94_v10 }
  0xc7   :  { %v102_v15 = vadd.f32 %v100_v14, %v98_v13 }
  0xc9   :  { %v106_v16 = vsel %vm34_vm0, %v102_v15, 0.0  ;;  %v130_v47 = vmul.f32 %v128_v30, %v102_v15  ;;  %v193_v30 = vstv %s242_s3 }
  0xca   :  { %107 = vadd.xlane.f32.xlu1 %v106_v16 }
 0x152   :  { %v105_v17 = vpop.xlane.xlu1 %104 }
 0x153   :  { %v109_v18 = vsel %vm34_vm0, %v105_v17, 0.0 }
 0x154   :  { %v110_v19 = vrot.slane %v109_v18, 4 }
 0x156   :  { %v111_v20 = vadd.f32 %v110_v19, %v109_v18 }
 0x157   :  { %v108_v21 = vpop.xlane.xlu1 %107 }
 0x158   :  { %v112_v22 = vrot.slane %v111_v20, 2  ;;  %v116_v23 = vsel %vm34_vm0, %v108_v21, 0.0 }
 0x159   :  { %v117_v24 = vrot.slane %v116_v23, 4 }
 0x15a   :  { %v113_v25 = vadd.f32 %v112_v22, %v111_v20 }
 0x15b   :  { %v118_v26 = vadd.f32 %v117_v24, %v116_v23 }
 0x15c   :  { %v114_v27 = vrot.slane %v113_v25, 1 }
 0x15d   :  { %v119_v28 = vrot.slane %v118_v26, 2 }
 0x15e   :  { %v115_v29 = vadd.f32 %v114_v27, %v113_v25 }
 0x15f   :  { %v120_v32 = vadd.f32 %v119_v28, %v118_v26 }
 0x160   :  { %v123_v33 = vmul.f32 0.00390625, %v115_v29  ;;  %v196_v29 = vstv %s243_s30 }
 0x161   :  { %v121_v35 = vrot.slane %v120_v32, 1 }
 0x162   :  { %v126_v37 = vmul.f32 %v125_v31, %v123_v33  ;;  %v201_v33 = vstv %s241_s4 }
 0x163   :  { %v122_v38 = vadd.f32 %v121_v35, %v120_v32 }
 0x164   :  { %v131_v42 = vadd.f32 %v129_v36, %v126_v37 }
 0x165   :  { %v124_v43 = vmul.f32 0.00390625, %v122_v38 }
 0x166   :  { %v136_v44 = vadd.f32 %v134_v39, %v131_v42  ;;  %v144_v45 = vadd.f32 %v142_v40, %v131_v42  ;;  %v152_v46 = vadd.f32 %v150_v41, %v131_v42 }
 0x167   :  { %v127_v48 = vmul.f32 %v125_v31, %v124_v43 }
 0x168   :  { %v138_v49 = vmax.f32 %v136_v44, 0.0  ;;  %v146_v50 = vmax.f32 %v144_v45, 0.0  ;;  %v154_v51 = vmax.f32 %v152_v46, 0.0 }
 0x169   :  { %v132_v55 = vadd.f32 %v130_v47, %v127_v48 }
 0x16a   :  { %v140_v56 = vmin.f32 %v138_v49, 1.0  ;;  %v148_v60 = vmin.f32 %v146_v50, 1.0  ;;  %v156_v61 = vmin.f32 %v154_v51, 1.0 }
 0x16b   :  { %v137_v57 = vadd.f32 %v135_v52, %v132_v55  ;;  %v145_v58 = vadd.f32 %v143_v53, %v132_v55  ;;  %v153_v59 = vadd.f32 %v151_v54, %v132_v55 }
 0x16c   :  { %v161_v62 = vmul.f32 0.2989, %v140_v56  ;;  %v163_v63 = vmul.f32 0.587, %v148_v60  ;;  %v167_v3 = vmul.f32 0.114, %v156_v61  ;;  %v202_v38 = vmul.f32 %v201_v33, %v140_v56 }
 0x16d   :  { %v139_v0 = vmax.f32 %v137_v57, 0.0  ;;  %v147_v1 = vmax.f32 %v145_v58, 0.0  ;;  %v155_v4 = vmax.f32 %v153_v59, 0.0  ;;  %v210_v39 = vmul.f32 %v201_v33, %v148_v60 }
 0x16e   :  { %v165_v2 = vadd.f32 %v163_v63, %v161_v62  ;;  %v218_v40 = vmul.f32 %v201_v33, %v156_v61 }
 0x16f   :  { %v141_v5 = vmin.f32 %v139_v0, 1.0  ;;  %v149_v8 = vmin.f32 %v147_v1, 1.0  ;;  %v157_v6 = vmin.f32 %v155_v4, 1.0 }
 0x170   :  { %v169_v10 = vadd.f32 %v167_v3, %v165_v2 }
 0x171   :  { %v162_v7 = vmul.f32 0.2989, %v141_v5  ;;  %v164_v9 = vmul.f32 0.587, %v149_v8  ;;  %v168_v13 = vmul.f32 0.114, %v157_v6  ;;  %v203_v51 = vmul.f32 %v201_v33, %v141_v5 }
 0x172   :  { %v171_v11 = vsel %vm34_vm0, %v169_v10, 0.0  ;;  %v197_v35 = vmul.f32 %v196_v29, %v169_v10  ;;  %v211_v52 = vmul.f32 %v201_v33, %v149_v8  ;;  %v219_v53 = vmul.f32 %v201_v33, %v157_v6 }
 0x173   :  { %172 = vadd.xlane.f32.xlu0 %v171_v11  ;;  %v166_v12 = vadd.f32 %v164_v9, %v162_v7 }
 0x175   :  { %v170_v14 = vadd.f32 %v168_v13, %v166_v12 }
 0x177   :  { %v174_v15 = vsel %vm34_vm0, %v170_v14, 0.0  ;;  %v198_v46 = vmul.f32 %v196_v29, %v170_v14 }
 0x178   :  { %175 = vadd.xlane.f32.xlu1 %v174_v15 }
 0x200   :  { %v173_v16 = vpop.xlane.xlu0 %172 }
 0x201   :  { %v177_v17 = vsel %vm34_vm0, %v173_v16, 0.0 }
 0x202   :  { %v178_v18 = vrot.slane %v177_v17, 4 }
 0x204   :  { %v179_v19 = vadd.f32 %v178_v18, %v177_v17 }
 0x205   :  { %v176_v20 = vpop.xlane.xlu1 %175 }
 0x206   :  { %v180_v21 = vrot.slane %v179_v19, 2  ;;  %v184_v22 = vsel %vm34_vm0, %v176_v20, 0.0 }
 0x207   :  { %v185_v23 = vrot.slane %v184_v22, 4 }
 0x208   :  { %v181_v24 = vadd.f32 %v180_v21, %v179_v19 }
 0x209   :  { %v186_v25 = vadd.f32 %v185_v23, %v184_v22 }
 0x20a   :  { %v182_v26 = vrot.slane %v181_v24, 1 }
 0x20b   :  { %v187_v27 = vrot.slane %v186_v25, 2 }
 0x20c   :  { %v183_v28 = vadd.f32 %v182_v26, %v181_v24 }
 0x20d   :  { %v188_v31 = vadd.f32 %v187_v27, %v186_v25 }
 0x20e   :  { %v191_v32 = vmul.f32 0.00390625, %v183_v28 }
 0x20f   :  { %v189_v34 = vrot.slane %v188_v31, 1 }
 0x210   :  { %v194_v36 = vmul.f32 %v193_v30, %v191_v32 }
 0x211   :  { %v190_v37 = vadd.f32 %v189_v34, %v188_v31 }
 0x212   :  { %v199_v41 = vadd.f32 %v197_v35, %v194_v36 }
 0x213   :  { %v192_v42 = vmul.f32 0.00390625, %v190_v37 }
 0x214   :  { %v204_v43 = vadd.f32 %v202_v38, %v199_v41  ;;  %v212_v44 = vadd.f32 %v210_v39, %v199_v41  ;;  %v220_v45 = vadd.f32 %v218_v40, %v199_v41 }
 0x215   :  { %v195_v47 = vmul.f32 %v193_v30, %v192_v42 }
 0x216   :  { %v206_v48 = vmax.f32 %v204_v43, 0.0  ;;  %v214_v49 = vmax.f32 %v212_v44, 0.0  ;;  %v222_v50 = vmax.f32 %v220_v45, 0.0 }
 0x217   :  { %v200_v54 = vadd.f32 %v198_v46, %v195_v47 }
 0x218   :  { %v208_v55 = vmin.f32 %v206_v48, 1.0  ;;  %v216_v57 = vmin.f32 %v214_v49, 1.0  ;;  %v224_v58 = vmin.f32 %v222_v50, 1.0 }
 0x219   :  { %v205_v56 = vadd.f32 %v203_v51, %v200_v54  ;;  %v213_v60 = vadd.f32 %v211_v52, %v200_v54  ;;  %v221_v61 = vadd.f32 %v219_v53, %v200_v54 }
 0x21a   :  { %226 = vst [vmem:[%s328_s2] sm:$0x3] %v208_v55  ;;  %228 = vst [vmem:[%s328_s2 + $0x2] sm:$0x3] %v216_v57 }
 0x21b   :  { %230 = vst [vmem:[%s328_s2 + $0x4] sm:$0x3] %v224_v58  ;;  %v207_v59 = vmax.f32 %v205_v56, 0.0  ;;  %v215_v62 = vmax.f32 %v213_v60, 0.0  ;;  %v223_v63 = vmax.f32 %v221_v61, 0.0 }
 0x21d   :  { %v209_v0 = vmin.f32 %v207_v59, 1.0  ;;  %v217_v1 = vmin.f32 %v215_v62, 1.0  ;;  %v225_v2 = vmin.f32 %v223_v63, 1.0 }
 0x21f   :  { %227 = vst [vmem:[%s328_s2 + $0x8] sm:$0x3] %v209_v0  ;;  %229 = vst [vmem:[%s328_s2 + $0xa] sm:$0x3] %v217_v1 }
 0x220   :  { %231 = vst [vmem:[%s328_s2 + $0xc] sm:$0x3] %v225_v2 }

</bundles_post_ra>
